<compile_context>
chip_gen: v7x
topology: tpu7x:2x2x1
jax: 0.10.0
libtpu: 0.0.40
codegen_flags: <defaults>
</compile_context>

<pallas_src>
import jax
import jax.numpy as jnp
from jax.experimental import pallas as pl
from jax.experimental.pallas import tpu as pltpu

_LANE = 128     # vreg lane width
_SUBLANE = 8    # vreg sublane height (f32)


def _round_up(v, m):
    return ((v + m - 1) // m) * m


def _sigmoid_kernel(x_ref, o_ref):
    # sigmoid(x) = 1 / (1 + exp(-x)), computed in f32 regardless of input dtype
    # (matches PyTorch's internal math; free for a mem-bound kernel, and on v5e the
    # VPU/EUP have no bf16 anyway). Exact reciprocal -- the approx path caused the
    # previous correctness failure and buys nothing under the HBM bound.
    x = x_ref[...].astype(jnp.float32)
    z = 1.0 / (1.0 + jnp.exp(-x))
    o_ref[...] = z.astype(o_ref.dtype)


def sigmoid_layer(x, *, tile_m=512, tile_n=2048):
    """Forward pass of SigmoidLayer: elementwise sigmoid of a (batch, features) array."""
    M, N = x.shape

    # Feature (lane) tiling: no pad / slice wrapper passes.
    #  - N a multiple of 128: tile normally (last block, if ragged in count, is still
    #    a lane-dense multiple of 128 -> unmasked full-width stores).
    #  - otherwise: make the block span the full row (block_shape equal to the full
    #    array dim satisfies the (8,128) rule), so each DMA is one contiguous stripe.
    if N % _LANE == 0:
        tn = min(tile_n, N)
    else:
        tn = N

    # Batch (sublane) tiling: tile_m rows (multiple of 8) or the full dim when smaller.
    tm = tile_m if M > tile_m else M

    grid_m = pl.cdiv(M, tm)
    grid_n = pl.cdiv(N, tn)

    # v7x has 2 TensorCores sharing HBM; a 1-step grid leaves half the chip idle.
    # For mid-sized inputs that would collapse to a single step, split the batch dim.
    if grid_m == 1 and grid_n == 1 and M >= 2 * _SUBLANE:
        tm = _round_up(pl.cdiv(M, 2), _SUBLANE)
        grid_m = pl.cdiv(M, tm)

    grid = (grid_m, grid_n)

    # Tile budget: 512x2048 f32 = 4 MiB/tile; in + out, double-buffered = 16 MiB.
    # Raise the scoped-VMEM limit to 32 MiB so v5e's 16 MiB default doesn't cap it;
    # 32 MiB is within physical VMEM on v5e/v6e (128 MiB) and v7x (64 MiB per TC).
    out = pl.pallas_call(
        _sigmoid_kernel,
        out_shape=jax.ShapeDtypeStruct((M, N), x.dtype),
        grid_spec=pltpu.PrefetchScalarGridSpec(
            num_scalar_prefetch=0,
            grid=grid,
            in_specs=[pl.BlockSpec((tm, tn), lambda i, j: (i, j))],
            out_specs=pl.BlockSpec((tm, tn), lambda i, j: (i, j)),
        ),
        compiler_params=pltpu.CompilerParams(
            dimension_semantics=("parallel", "parallel"),
            vmem_limit_bytes=32 << 20,
        ),
    )(x)

    return out


if __name__ == "__main__":
    # Shape implied by the module: (batch_size, num_features).
    key = jax.random.PRNGKey(0)
    batch_size, num_features = 2, 32
    x_small = jax.random.normal(key, (batch_size, num_features), dtype=jnp.float32)

    y_small = jax.block_until_ready(sigmoid_layer(x_small))
    ref_small = 1.0 / (1.0 + jnp.exp(-x_small))
    assert y_small.shape == x_small.shape and y_small.dtype == x_small.dtype
    assert jnp.allclose(y_small, ref_small, atol=1e-5, rtol=1e-5)

    # Second check: ragged feature dim (N not a multiple of 128) -> full-row stripe path.
    x_big = jax.random.normal(jax.random.PRNGKey(1), (40, 200), dtype=jnp.float32)
    y_big = jax.block_until_ready(sigmoid_layer(x_big))
    ref_big = 1.0 / (1.0 + jnp.exp(-x_big))
    assert y_big.shape == x_big.shape
    assert jnp.allclose(y_big, ref_big, atol=1e-5, rtol=1e-5)

    # TODO(synk): backward() (delta @ ((1-Z)*Z)) and the cached self.Z state are not part
    # of the requested forward-pass kernel.
    print("KERNEL_OK")
</pallas_src>

<mosaic_0001>
module attributes {stable_mosaic.version = 11 : i64} {
  func.func @_sigmoid_kernel(%arg0: i32, %arg1: i32, %arg2: memref<2x32xf32, #tpu.memory_space<vmem>>, %arg3: memref<2x32xf32, #tpu.memory_space<vmem>>) attributes {dimension_semantics = [#tpu.dimension_semantics<parallel>, #tpu.dimension_semantics<parallel>], iteration_bounds = array<i64: 1, 1>, scalar_prefetch = 0 : i64, scratch_operands = 0 : i64, tpu.core_type = #tpu.core_type<tc>, window_params = [{transform_indices = @transform_0, window_bounds = array<i64: 2, 32>}, {transform_indices = @transform_1, window_bounds = array<i64: 2, 32>}]} {
    %c0 = arith.constant 0 : index
    %c0_0 = arith.constant 0 : index
    %0 = vector.load %arg2[%c0, %c0_0] : memref<2x32xf32, #tpu.memory_space<vmem>>, vector<2x32xf32>
    %cst = arith.constant 0.000000e+00 : f32
    %1 = vector.broadcast %cst : f32 to vector<2x32xf32>
    %2 = arith.subf %1, %0 : vector<2x32xf32>
    %3 = math.exp %2 : vector<2x32xf32>
    %cst_1 = arith.constant 1.000000e+00 : f32
    %4 = vector.broadcast %cst_1 : f32 to vector<2x32xf32>
    %5 = arith.addf %4, %3 : vector<2x32xf32>
    %cst_2 = arith.constant 1.000000e+00 : f32
    %6 = vector.broadcast %cst_2 : f32 to vector<2x32xf32>
    %7 = arith.divf %6, %5 : vector<2x32xf32>
    %c0_3 = arith.constant 0 : index
    %c0_4 = arith.constant 0 : index
    %8 = vector.load %arg3[%c0_3, %c0_4] : memref<2x32xf32, #tpu.memory_space<vmem>>, vector<2x32xf32>
    tpu.vector_store %arg3[%c0_3, %c0_4], %7 {strides = array<i32>} : memref<2x32xf32, #tpu.memory_space<vmem>>, vector<2x32xf32>,
    return
  }
  func.func @transform_0(%arg0: i32, %arg1: i32) -> (i32, i32) {
    %c0_i32 = arith.constant 0 : i32
    return %arg0, %arg1 : i32, i32
  }
  func.func @transform_1(%arg0: i32, %arg1: i32) -> (i32, i32) {
    %c0_i32 = arith.constant 0 : i32
    return %arg0, %arg1 : i32, i32
  }
}

</mosaic_0001>

<bundles_post_ra>
// kernel: tpu_custom_call.1
= control target key start
LH: loop header
LB: loop body
LE: loop exit
PB: predicated region body
PF: predicated region fallthrough
CT: control target
= control target key end

     0   :  { %6 = vsyncpa [#allocation3], 0  ;;  %s135_s0 = inlined_call_operand.hbm [shape: f32[2,32], index: 0, kind: input, shape index: {}]   ;;  %s136_s1 = inlined_call_operand.hbm [shape: f32[2,32], index: 1, kind: output, shape index: {}]  }
   0x1   :  { %7 = vsyncpa [#allocation4], 0  ;;  %s99_s6 = smov [#allocation2]   ;;  %s51_s10 = scalar_lea.hbm %s135_s0, 32 }
   0x2   :  { %s14_s7 = sshll.u32 %s99_s6, 4  ;;  %p52_p0 = scmp.ne.s32.totalorder %s135_s0, %s51_s10  ;;  %s15_s7 = int_to_ptr.vmem [resolvable:$true] %s14_s7 }
   0x3   :  { %p55_p1 = scmp.lt.u32.totalorder %s51_s10, %s135_s0 }
   0x5   :  { %p57_p2 = pnand %p55_p1, %p52_p0 }
   0x7   :  { %60 = shalt.err (!%p57_p2)
}
   0x8   :  { %s61_s15 = scalar_lea.vmem %s15_s7, 32  ;;  %p66_p4 = scmp.lt.s32.totalorder %s15_s7, %s15_s7 }
   0x9   :  { %p62_p3 = scmp.ne.s32.totalorder %s15_s7, %s61_s15  ;;  %p67_p5 = scmp.lt.s32.totalorder %s61_s15, %s61_s15 }
   0xb   :  { %p68_p6 = por %p67_p5, %p66_p4 }
   0xd   :  { %p69_p7 = pnand %p68_p6, %p62_p3 }
   0xf   :  { %72 = shalt.err (!%p69_p7)
}
  0x10   :  { %17 = dma.hbm_to_vmem [thread:$0]  %s135_s0, 32, %s15_s7, [#allocation3]  }
  0x11   :  { %95 = dma.done.wait [#allocation3], 32  }
  0x12   :  { %96 = vsyncadd [#allocation3], 4294967264  ;;  %v21_v0 = vld [vmem:[#allocation2] sm:$0x3]  ;;  %s100_s18 = smov [#allocation5]   ;;  %vm28_vm0 = vcmask 254976  }
  0x13   :  { %v22_v1 = vsub.f32 0.0, %v21_v0  ;;  %s36_s19 = sshll.u32 %s100_s18, 4  ;;  %s37_s19 = int_to_ptr.vmem [resolvable:$true] %s36_s19 }
  0x14   :  { %s73_s20 = scalar_lea.vmem %s37_s19, 32  ;;  %p78_p9 = scmp.lt.s32.totalorder %s37_s19, %s37_s19 }
  0x15   :  { %v23_v2 = vmul.f32 1.442695, %v22_v1  ;;  %p74_p8 = scmp.ne.s32.totalorder %s37_s19, %s73_s20  ;;  %p79_p10 = scmp.lt.s32.totalorder %s73_s20, %s73_s20 }
  0x17   :  { %47 = vpow2.f32 %v23_v2  ;;  %p80_p11 = por %p79_p10, %p78_p9 }
  0x19   :  { %p81_p12 = pnand %p80_p11, %p74_p8 }
  0x21   :  { %v48_v3 = vpop.eup %47 }
  0x22   :  { %v25_v4 = vadd.f32 1.0, %v48_v3 }
  0x24   :  { %49 = vrcp.f32 %v25_v4 }
  0x2e   :  { %v50_v5 = vpop.eup %49 }
  0x2f   :  { %29 = vst.msk [vmem:[#allocation5] sm:$0x3] %vm28_vm0, %v50_v5 }
  0x30   :  { %84 = shalt.err (!%p81_p12)
}
  0x31   :  { %s85_s22 = scalar_lea.hbm %s136_s1, 32 }
  0x32   :  { %p86_p13 = scmp.ne.s32.totalorder %s136_s1, %s85_s22  ;;  %p89_p0 = scmp.lt.u32.totalorder %s85_s22, %s136_s1 }
  0x34   :  { %p91_p1 = pnand %p89_p0, %p86_p13 }
  0x36   :  { %94 = shalt.err (!%p91_p1)
}
  0x37   :  { %39 = dma.vmem_to_hbm [thread:$0]  %s37_s19, 32, %s136_s1, [#allocation4]  }
  0x38   :  { %97 = dma.done.wait [#allocation4], 32  }
  0x39   :  { %98 = vsyncadd [#allocation4], 4294967264 }
  0x3a   :  { %43 = vsyncpa [#allocation3], 1 }
  0x3b   :  { %44 = vsyncpa [#allocation4], 1 }

</bundles_post_ra>
